<compile_context>
chip_gen: v7x
topology: tpu7x:2x2x1
jax: 0.10.0
libtpu: 0.0.40
codegen_flags: <defaults>
</compile_context>

<pallas_src>
import functools

import jax
import jax.numpy as jnp
from jax.experimental import pallas as pl
from jax.experimental.pallas import tpu as pltpu

_TM = 512                        # target row tile for 1x1 convs
_LANE_BLOCK = 128                # channel (lane) block for the grouped 3x3 conv
_VMEM_LIMIT = 48 * 1024 * 1024   # explicit VMEM budget (fits v7x's 64 MiB physical)


def _cparams(sem):
    return pltpu.CompilerParams(dimension_semantics=sem,
                                vmem_limit_bytes=_VMEM_LIMIT)


def _round_up(x, m):
    return (x + m - 1) // m * m


def _pick_tile(total, target):
    """Largest divisor of `total` that is <= target (>= 1)."""
    t = min(total, max(1, target))
    while total % t:
        t -= 1
    return t


def _divisor_tile(total, target, multiple):
    """Largest multiple-of-`multiple` divisor of `total` that is <= target, else 0."""
    t = min(total, target)
    t -= t % multiple
    while t >= multiple:
        if total % t == 0:
            return t
        t -= multiple
    return 0


# ---------------------------------------------------------------------------
# Kernels
# ---------------------------------------------------------------------------
def _mm_affine_kernel(x_ref, w_ref, s_ref, b_ref, *rest, relu, has_res):
    """(x @ w) * scale + bias [+ residual] [-> relu].  1x1 conv + folded BN."""
    if has_res:
        r_ref, o_ref = rest
    else:
        (o_ref,) = rest
        r_ref = None
    y = jnp.dot(x_ref[...], w_ref[...], preferred_element_type=jnp.float32)
    y = y * s_ref[...] + b_ref[...]
    if r_ref is not None:
        y = y + r_ref[...].astype(jnp.float32)
    if relu:
        y = jnp.maximum(y, 0.0)
    o_ref[...] = y.astype(o_ref.dtype)


def _gconv3x3_kernel(x_ref, w_ref, s_ref, b_ref, o_ref, xpad_ref, *, stride, th):
    """Grouped 3x3 conv for ONE 128-lane channel block + folded BN + ReLU.

    x_ref    : (h, w, lb)       un-padded input of this lane block (resident across
                                the row-tile grid axis: its block index ignores it)
    w_ref    : (3, 3, lb, lb)   block-diagonal (within the lane block) weights
    o_ref    : (th, w_out, lb)  output row tile
    xpad_ref : (h+2, w+4, lb)   VMEM scratch: zero-halo padded copy of the image.
                                Image lives at rows [1, h+1), cols [2, w+2).
    Stride is folded in via strided reads; row-tile index = program_id(2).
    """
    h, w, lb = x_ref.shape
    _, w_out, _ = o_ref.shape
    i = pl.program_id(2)

    # Build the zero-halo image once per (image, lane-block).  The column offset of 2
    # keeps the store aligned to the bf16 sublane packing; the row offset is in the
    # (untiled) major dim.  The row-tile axis is "arbitrary", so i==0 runs first.
    @pl.when(i == 0)
    def _():
        xpad_ref[...] = jnp.zeros_like(xpad_ref)
        xpad_ref[pl.ds(1, h), pl.ds(2, w), :] = x_ref[...]

    row0 = pl.multiple_of(i * th * stride, th * stride)
    acc = jnp.zeros((th * w_out, lb), jnp.float32)
    for kh in range(3):
        for kw in range(3):
            # output (r, c) tap (kh, kw) -> padded row row0 + kh + r*stride,
            #                               padded col kw + 1 + c*stride.
            if stride == 1:
                patch = xpad_ref[pl.ds(row0 + kh, th), pl.ds(kw + 1, w_out), :]
            else:
                patch = xpad_ref[pl.ds(row0 + kh, th, stride=stride),
                                 pl.ds(kw + 1, w_out, stride=stride), :]
            acc += jnp.dot(patch.reshape(th * w_out, lb), w_ref[kh, kw],
                           preferred_element_type=jnp.float32)
    y = jnp.maximum(acc * s_ref[...] + b_ref[...], 0.0)
    o_ref[...] = y.reshape(th, w_out, lb).astype(o_ref.dtype)


def _shortcut_kernel(x_ref, w_ref, s_ref, b_ref, o_ref, *, stride):
    """Strided 1x1 projection shortcut + folded BN; spatial subsample done in-kernel."""
    h_out, w_out, cout = o_ref.shape
    cin = x_ref.shape[-1]
    if stride == 1:
        xs = x_ref[...]
    else:
        xs = x_ref[pl.ds(0, h_out, stride=stride),
                   pl.ds(0, w_out, stride=stride), :]
    y = jnp.dot(xs.reshape(h_out * w_out, cin), w_ref[...],
                preferred_element_type=jnp.float32)
    y = y * s_ref[...] + b_ref[...]
    o_ref[...] = y.reshape(h_out, w_out, cout).astype(o_ref.dtype)


# ---------------------------------------------------------------------------
# Pallas-call wrappers
# ---------------------------------------------------------------------------
def conv1x1_bn(x, w, scale, bias, residual=None, relu=True):
    """x: (N,H,W,Cin) NHWC -> (N,H,W,Cout); fused 1x1 conv + folded BN (+res)(+relu)."""
    n, h, wd, cin = x.shape
    cout = w.shape[1]
    m = n * h * wd
    tm = _divisor_tile(m, _TM, 8)          # prefer a divisor -> no pad copy
    if tm == 0:
        tm = min(_TM, _round_up(m, 8))
    m_pad = _round_up(m, tm)

    xm = x.reshape(m, cin)
    if m_pad != m:
        xm = jnp.pad(xm, ((0, m_pad - m), (0, 0)))
    s2d = scale.reshape(1, cout).astype(jnp.float32)
    b2d = bias.reshape(1, cout).astype(jnp.float32)

    inputs = [xm, w, s2d, b2d]
    in_specs = [
        pl.BlockSpec((tm, cin), lambda i: (i, 0)),
        pl.BlockSpec((cin, cout), lambda i: (0, 0)),
        pl.BlockSpec((1, cout), lambda i: (0, 0)),
        pl.BlockSpec((1, cout), lambda i: (0, 0)),
    ]
    if residual is not None:
        rm = residual.reshape(m, cout)
        if m_pad != m:
            rm = jnp.pad(rm, ((0, m_pad - m), (0, 0)))
        inputs.append(rm)
        in_specs.append(pl.BlockSpec((tm, cout), lambda i: (i, 0)))

    out = pl.pallas_call(
        functools.partial(_mm_affine_kernel, relu=relu,
                          has_res=residual is not None),
        out_shape=jax.ShapeDtypeStruct((m_pad, cout), x.dtype),
        grid=(m_pad // tm,),
        in_specs=in_specs,
        out_specs=pl.BlockSpec((tm, cout), lambda i: (i, 0)),
        compiler_params=_cparams(("parallel",)),
    )(*inputs)
    return out[:m].reshape(n, h, wd, cout)


def gconv3x3_bn_relu(x, w_packed, scale, bias, stride):
    """Grouped 3x3 conv (pad=1, stride=s) + BN + ReLU.

    x: (N,H,W,C) NHWC, w_packed: (n_lb, 3, 3, lb, lb) lane-block block-diag weights.
    Zero halo is built inside the kernel (VMEM scratch) -> no jnp.pad HBM pass.
    """
    n, h, w, c = x.shape
    n_lb, _, _, lb, _ = w_packed.shape
    assert n_lb * lb == c
    h_out = (h - 1) // stride + 1
    w_out = (w - 1) // stride + 1
    th = _pick_tile(h_out, max(1, 512 // w_out))   # bound the f32 accumulator
    n_ht = h_out // th

    kernel = functools.partial(_gconv3x3_kernel, stride=stride, th=th)
    return pl.pallas_call(
        kernel,
        out_shape=jax.ShapeDtypeStruct((n, h_out, w_out, c), x.dtype),
        grid=(n, n_lb, n_ht),
        in_specs=[
            # Un-padded image of this lane block: block index independent of the
            # row-tile axis -> fetched once, stays resident across h-tiles.
            pl.BlockSpec((None, h, w, lb), lambda b, g, i: (b, 0, 0, g)),
            pl.BlockSpec((None, 3, 3, lb, lb), lambda b, g, i: (g, 0, 0, 0, 0)),
            pl.BlockSpec((1, lb), lambda b, g, i: (0, g)),
            pl.BlockSpec((1, lb), lambda b, g, i: (0, g)),
        ],
        out_specs=pl.BlockSpec((None, th, w_out, lb), lambda b, g, i: (b, i, 0, g)),
        scratch_shapes=[pltpu.VMEM((h + 2, w + 4, lb), x.dtype)],
        # Row-tile axis must stay un-split and in-order (scratch filled at i == 0).
        compiler_params=_cparams(("parallel", "parallel", "arbitrary")),
    )(x, w_packed,
      scale.reshape(1, c).astype(jnp.float32),
      bias.reshape(1, c).astype(jnp.float32))


def shortcut_conv_bn(x, w, scale, bias, stride):
    """1x1 stride-s projection shortcut + folded BN (subsample fused in-kernel)."""
    n, h, wd, cin = x.shape
    cout = w.shape[1]
    if stride == 1:
        return conv1x1_bn(x, w, scale, bias, relu=False)
    h_out = (h - 1) // stride + 1
    w_out = (wd - 1) // stride + 1
    kernel = functools.partial(_shortcut_kernel, stride=stride)
    return pl.pallas_call(
        kernel,
        out_shape=jax.ShapeDtypeStruct((n, h_out, w_out, cout), x.dtype),
        grid=(n,),
        in_specs=[
            pl.BlockSpec((None, h, wd, cin), lambda b: (b, 0, 0, 0)),
            pl.BlockSpec((cin, cout), lambda b: (0, 0)),
            pl.BlockSpec((1, cout), lambda b: (0, 0)),
            pl.BlockSpec((1, cout), lambda b: (0, 0)),
        ],
        out_specs=pl.BlockSpec((None, h_out, w_out, cout), lambda b: (b, 0, 0, 0)),
        compiler_params=_cparams(("parallel",)),
    )(x, w, scale.reshape(1, cout).astype(jnp.float32),
      bias.reshape(1, cout).astype(jnp.float32))


# ---------------------------------------------------------------------------
# Parameter construction (deterministic, synthetic)
# ---------------------------------------------------------------------------
def _fold_bn(gamma, beta, mean, var, eps=1e-5):
    scale = gamma / jnp.sqrt(var + eps)
    return scale, beta - mean * scale


def _init_bn(key, c):
    k1, k2, k3, k4 = jax.random.split(key, 4)
    gamma = 1.0 + 0.1 * jax.random.normal(k1, (c,), jnp.float32)
    beta = 0.1 * jax.random.normal(k2, (c,), jnp.float32)
    mean = 0.1 * jax.random.normal(k3, (c,), jnp.float32)
    var = jax.random.uniform(k4, (c,), jnp.float32, 0.5, 1.5)
    return _fold_bn(gamma, beta, mean, var)


def _pack_grouped_weight(wg, lane_block):
    """(G,3,3,cpg,cpg) grouped weight -> (n_lb,3,3,lb,lb) per-lane-block block-diag.

    Each lane block packs lb//cpg groups; only its own diagonal Cin slice is kept,
    so memory / FLOPs scale with lb*c2, not c2*c2.
    """
    g_total, _, _, cpg, _ = wg.shape
    c2 = g_total * cpg
    lb = min(c2, lane_block)
    assert lb % cpg == 0, "group width must divide the lane block"
    assert c2 % lb == 0, "channel count must be a multiple of the lane block"
    gpb = lb // cpg
    n_lb = c2 // lb
    wg_b = wg.reshape(n_lb, gpb, 3, 3, cpg, cpg)
    eye = jnp.eye(gpb, dtype=wg.dtype)
    # out[n, kh, kw, j*cpg + a, k*cpg + b] = wg_b[n, j, kh, kw, a, b] * delta(j, k)
    w = jnp.einsum("njhwab,jk->nhwjakb", wg_b, eye)
    return w.reshape(n_lb, 3, 3, lb, lb)


def _init_block_params(key, c_in, c2, stride, cardinality, expansion,
                       dtype=jnp.bfloat16):
    c_out = expansion * c2
    cpg = c2 // cardinality
    keys = jax.random.split(key, 8)
    p = {"stride": stride}
    p["w1"] = (0.1 * jax.random.normal(keys[0], (c_in, c2), jnp.float32)).astype(dtype)
    p["bn1"] = _init_bn(keys[1], c2)
    wg = 0.1 * jax.random.normal(keys[2], (cardinality, 3, 3, cpg, cpg), jnp.float32)
    p["w2"] = _pack_grouped_weight(wg.astype(dtype), _LANE_BLOCK)
    p["bn2"] = _init_bn(keys[3], c2)
    p["w3"] = (0.1 * jax.random.normal(keys[4], (c2, c_out), jnp.float32)).astype(dtype)
    p["bn3"] = _init_bn(keys[5], c_out)
    p["has_shortcut"] = (stride != 1) or (c_in != c_out)
    if p["has_shortcut"]:
        p["w_sc"] = (0.1 * jax.random.normal(keys[6], (c_in, c_out),
                                             jnp.float32)).astype(dtype)
        p["bn_sc"] = _init_bn(keys[7], c_out)
    return p


def init_stage_params(key, c1, c2, stride=1, num_blocks=1, expansion=2, cardinality=32):
    keys = jax.random.split(key, num_blocks)
    params = [_init_block_params(keys[0], c1, c2, stride, cardinality, expansion)]
    for b in range(1, num_blocks):
        params.append(_init_block_params(keys[b], expansion * c2, c2, 1,
                                         cardinality, expansion))
    return params


# ---------------------------------------------------------------------------
# Forward pass
# ---------------------------------------------------------------------------
def resnext_block_forward(x, p):
    """x: NHWC bf16.  conv1x1-BN-ReLU -> gconv3x3-BN-ReLU -> conv1x1-BN (+sc) -> ReLU."""
    s = p["stride"]
    y = conv1x1_bn(x, p["w1"], *p["bn1"], relu=True)
    y = gconv3x3_bn_relu(y, p["w2"], *p["bn2"], stride=s)
    if p["has_shortcut"]:
        res = shortcut_conv_bn(x, p["w_sc"], *p["bn_sc"], stride=s)
    else:
        res = x
    return conv1x1_bn(y, p["w3"], *p["bn3"], residual=res, relu=True)


def resnext_stage_forward(x_nchw, params):
    x = jnp.transpose(x_nchw, (0, 2, 3, 1)).astype(jnp.bfloat16)   # NCHW -> NHWC bf16
    for p in params:
        x = resnext_block_forward(x, p)
    return jnp.transpose(x, (0, 3, 1, 2)).astype(jnp.float32)      # NHWC -> NCHW


# ---------------------------------------------------------------------------
if __name__ == "__main__":
    key = jax.random.PRNGKey(0)
    kx, kp = jax.random.split(key)

    # Small but lane-friendly config consistent with
    # ResNeXtStage(c1, c2, stride, num_blocks, expansion, cardinality):
    # cardinality matches the module default (32); channels are multiples of 128.
    c1, c2, stride, num_blocks, expansion, cardinality = 64, 128, 2, 2, 2, 32

    x = jax.random.normal(kx, (2, c1, 16, 16), jnp.float32)   # NCHW, like PyTorch
    params = init_stage_params(kp, c1, c2, stride=stride, num_blocks=num_blocks,
                               expansion=expansion, cardinality=cardinality)

    out = resnext_stage_forward(x, params)
    out = jax.block_until_ready(out)
    assert out.shape == (2, expansion * c2, 8, 8), out.shape
    assert bool(jnp.all(jnp.isfinite(out)))
    print("KERNEL_OK")
</pallas_src>

<mosaic_0001>
module attributes {stable_mosaic.version = 11 : i64} {
  func.func @_mm_affine_kernel(%arg0: i32, %arg1: memref<512x64xbf16, #tpu.memory_space<vmem>>, %arg2: memref<64x128xbf16, #tpu.memory_space<vmem>>, %arg3: memref<1x128xf32, #tpu.memory_space<vmem>>, %arg4: memref<1x128xf32, #tpu.memory_space<vmem>>, %arg5: memref<512x128xbf16, #tpu.memory_space<vmem>>) attributes {dimension_semantics = [#tpu.dimension_semantics<parallel>], iteration_bounds = array<i64: 1>, scalar_prefetch = 0 : i64, scratch_operands = 0 : i64, tpu.core_type = #tpu.core_type<tc>, window_params = [{transform_indices = @transform_0, window_bounds = array<i64: 512, 64>}, {pipeline_mode = #tpu.pipeline_mode<synchronous>, transform_indices = @transform_1, window_bounds = array<i64: 64, 128>}, {pipeline_mode = #tpu.pipeline_mode<synchronous>, transform_indices = @transform_2, window_bounds = array<i64: 1, 128>}, {pipeline_mode = #tpu.pipeline_mode<synchronous>, transform_indices = @transform_3, window_bounds = array<i64: 1, 128>}, {transform_indices = @transform_4, window_bounds = array<i64: 512, 128>}]} {
    %c0 = arith.constant 0 : index
    %c0_0 = arith.constant 0 : index
    %0 = vector.load %arg1[%c0, %c0_0] : memref<512x64xbf16, #tpu.memory_space<vmem>>, vector<512x64xbf16>
    %c0_1 = arith.constant 0 : index
    %c0_2 = arith.constant 0 : index
    %1 = vector.load %arg2[%c0_1, %c0_2] : memref<64x128xbf16, #tpu.memory_space<vmem>>, vector<64x128xbf16>
    %cst = arith.constant dense<0.000000e+00> : vector<512x128xf32>
    %2 = tpu.matmul %0, %1, %cst {dimension_numbers = #tpu.dot_dimension_numbers<[1], [0], [0], [1], [0, 0, 1, 1], [], []>} : vector<512x64xbf16>, vector<64x128xbf16>, vector<512x128xf32> -> vector<512x128xf32>
    %c0_3 = arith.constant 0 : index
    %c0_4 = arith.constant 0 : index
    %3 = vector.load %arg3[%c0_3, %c0_4] : memref<1x128xf32, #tpu.memory_space<vmem>>, vector<1x128xf32>
    %4 = vector.broadcast %3 : vector<1x128xf32> to vector<512x128xf32>
    %5 = arith.mulf %2, %4 : vector<512x128xf32>
    %c0_5 = arith.constant 0 : index
    %c0_6 = arith.constant 0 : index
    %6 = vector.load %arg4[%c0_5, %c0_6] : memref<1x128xf32, #tpu.memory_space<vmem>>, vector<1x128xf32>
    %7 = vector.broadcast %6 : vector<1x128xf32> to vector<512x128xf32>
    %8 = arith.addf %5, %7 : vector<512x128xf32>
    %cst_7 = arith.constant 0.000000e+00 : f32
    %9 = vector.broadcast %cst_7 : f32 to vector<512x128xf32>
    %10 = arith.maximumf %8, %9 : vector<512x128xf32>
    %11 = arith.truncf %10 : vector<512x128xf32> to vector<512x128xbf16>
    %c0_8 = arith.constant 0 : index
    %c0_9 = arith.constant 0 : index
    %12 = vector.load %arg5[%c0_8, %c0_9] : memref<512x128xbf16, #tpu.memory_space<vmem>>, vector<512x128xbf16>
    tpu.vector_store %arg5[%c0_8, %c0_9], %11 {strides = array<i32>} : memref<512x128xbf16, #tpu.memory_space<vmem>>, vector<512x128xbf16>,
    return
  }
  func.func @transform_0(%arg0: i32) -> (i32, i32) {
    %c0_i32 = arith.constant 0 : i32
    %c0_i32_0 = arith.constant 0 : i32
    return %arg0, %c0_i32 : i32, i32
  }
  func.func @transform_1(%arg0: i32) -> (i32, i32) {
    %c0_i32 = arith.constant 0 : i32
    %c0_i32_0 = arith.constant 0 : i32
    %c0_i32_1 = arith.constant 0 : i32
    return %c0_i32, %c0_i32_0 : i32, i32
  }
  func.func @transform_2(%arg0: i32) -> (i32, i32) {
    %c0_i32 = arith.constant 0 : i32
    %c0_i32_0 = arith.constant 0 : i32
    %c0_i32_1 = arith.constant 0 : i32
    return %c0_i32, %c0_i32_0 : i32, i32
  }
  func.func @transform_3(%arg0: i32) -> (i32, i32) {
    %c0_i32 = arith.constant 0 : i32
    %c0_i32_0 = arith.constant 0 : i32
    %c0_i32_1 = arith.constant 0 : i32
    return %c0_i32, %c0_i32_0 : i32, i32
  }
  func.func @transform_4(%arg0: i32) -> (i32, i32) {
    %c0_i32 = arith.constant 0 : i32
    %c0_i32_0 = arith.constant 0 : i32
    return %arg0, %c0_i32 : i32, i32
  }
}

</mosaic_0001>

<bundles_post_ra>
// kernel: tpu_custom_call.1
= control target key start
LH: loop header
LB: loop body
LE: loop exit
PB: predicated region body
PF: predicated region fallthrough
CT: control target
= control target key end

     0   :  { %vm275_vm0 = vcmask 523264   ;;  %s2089_s0 = inlined_call_operand.vmem [shape: bf16[512,64], index: 0, kind: input, shape index: {}]   ;;  %s2090_s1 = inlined_call_operand.vmem [shape: bf16[64,128], index: 1, kind: input, shape index: {}]   ;;  %s2091_s2 = inlined_call_operand.vmem [shape: f32[1,128], index: 2, kind: input, shape index: {}]   ;;  %s2092_s3 = inlined_call_operand.vmem [shape: f32[1,128], index: 3, kind: input, shape index: {}]   ;;  %s2093_s4 = inlined_call_operand.hbm [shape: bf16[512,128], index: 4, kind: output, shape index: {}]  }
   0x1   :  { %v1711_v0 = vld [vmem:[%s2090_s1] sm:$0xff]   ;;  %v1712_v1 = vld [vmem:[%s2090_s1 + $0x8] sm:$0xff]   ;;  %v1713_v2 = vld [vmem:[%s2090_s1 + $0x10] sm:$0xff]  }
   0x2   :  { %1628 = vmatprep.subr.bf16.mxu0 %v1711_v0  ;;  %1700 = vmatprep.subr.bf16.mxu1 %v1711_v0  ;;  %v1715_v3 = vld [vmem:[%s2089_s0] sm:$0xff]   ;;  %v1714_v5 = vld [vmem:[%s2090_s1 + $0x18] sm:$0xff]   ;;  %v1717_v6 = vld [vmem:[%s2089_s0 + $0x8] sm:$0xff]  }
   0x3   :  { %1629 = vmatpush3.bf16.msra.mxu0 %v1711_v0  ;;  %1704 = vmatpush3.bf16.msra.mxu1 %v1711_v0  ;;  %v1716_v4 = vld [vmem:[%s2089_s0 + $0x80] sm:$0xff]   ;;  %v1718_v7 = vld [vmem:[%s2089_s0 + $0x88] sm:$0xff]   ;;  %v1719_v8 = vld [vmem:[%s2089_s0 + $0x10] sm:$0xff]  }
   0x4   :  { %1630 = vmatprep.subr.bf16.mxu0 %v1712_v1  ;;  %1701 = vmatprep.subr.bf16.mxu1 %v1712_v1  ;;  %v1720_v9 = vld [vmem:[%s2089_s0 + $0x90] sm:$0xff]   ;;  %v1721_v10 = vld [vmem:[%s2089_s0 + $0x18] sm:$0xff]   ;;  %v1723_v12 = vld [vmem:[%s2089_s0 + $0x20] sm:$0xff]  }
   0x5   :  { %1636 = vmatprep.mubr.msk.bf16.mxu0 %vm275_vm0, %v1715_v3  ;;  %1668 = vmatprep.mubr.msk.bf16.mxu1 %vm275_vm0, %v1716_v4  ;;  %v1722_v11 = vld [vmem:[%s2089_s0 + $0x98] sm:$0xff]   ;;  %v1724_v13 = vld [vmem:[%s2089_s0 + $0xa0] sm:$0xff]   ;;  %v1725_v14 = vld [vmem:[%s2089_s0 + $0x28] sm:$0xff]  }
   0x6   :  { %v1726_v15 = vld [vmem:[%s2089_s0 + $0xa8] sm:$0xff]   ;;  %v1727_v16 = vld [vmem:[%s2089_s0 + $0x30] sm:$0xff]  }
   0x7   :  { %1631 = vmatpush3.bf16.msra.mxu0 %v1712_v1  ;;  %1705 = vmatpush3.bf16.msra.mxu1 %v1712_v1  ;;  %v1728_v17 = vld [vmem:[%s2089_s0 + $0xb0] sm:$0xff]  }
   0x8   :  { %1632 = vmatprep.subr.bf16.mxu0 %v1713_v2  ;;  %1702 = vmatprep.subr.bf16.mxu1 %v1713_v2 }
   0xb   :  { %1633 = vmatpush3.bf16.msra.mxu0 %v1713_v2  ;;  %1706 = vmatpush3.bf16.msra.mxu1 %v1713_v2 }
   0xc   :  { %1634 = vmatprep.subr.bf16.mxu0 %v1714_v5  ;;  %1703 = vmatprep.subr.bf16.mxu1 %v1714_v5 }
   0xf   :  { %1635 = vmatpush3.bf16.msra.mxu0 %v1714_v5  ;;  %1707 = vmatpush3.bf16.msra.mxu1 %v1714_v5 }
  0x12   :  { %1637 = vmatmul.mubr.msk.bf16.vlgmr.msra.gmra.mrb[0].mxu0 %vm275_vm0, %v1717_v6  ;;  %1669 = vmatmul.mubr.msk.bf16.vlgmr.msra.gmra.mrb[0].mxu1 %vm275_vm0, %v1718_v7 }
  0x13   :  { %1640 = vmatprep.mubr.msk.bf16.mxu0 %vm275_vm0, %v1719_v8  ;;  %1672 = vmatprep.mubr.msk.bf16.mxu1 %vm275_vm0, %v1720_v9 }
  0x1a   :  { %1641 = vmatmul.mubr.msk.bf16.gmra.mrb[4].mxu0 %vm275_vm0, %v1721_v10  ;;  %1673 = vmatmul.mubr.msk.bf16.gmra.mrb[4].mxu1 %vm275_vm0, %v1722_v11 }
  0x1b   :  { %1644 = vmatprep.mubr.msk.bf16.mxu0 %vm275_vm0, %v1723_v12  ;;  %1676 = vmatprep.mubr.msk.bf16.mxu1 %vm275_vm0, %v1724_v13 }
  0x22   :  { %1645 = vmatmul.mubr.msk.bf16.gmra.mrb[8].mxu0 %vm275_vm0, %v1725_v14  ;;  %1677 = vmatmul.mubr.msk.bf16.gmra.mrb[8].mxu1 %vm275_vm0, %v1726_v15 }
  0x23   :  { %1648 = vmatprep.mubr.msk.bf16.mxu0 %vm275_vm0, %v1727_v16  ;;  %1680 = vmatprep.mubr.msk.bf16.mxu1 %vm275_vm0, %v1728_v17 }
  0x24   :  { %9 = vsyncpa [#allocation3], 0  ;;  %v1729_v18 = vld [vmem:[%s2089_s0 + $0x38] sm:$0xff]   ;;  %v1731_v20 = vld [vmem:[%s2089_s0 + $0x40] sm:$0xff]  }
  0x25   :  { %v1730_v19 = vld [vmem:[%s2089_s0 + $0xb8] sm:$0xff]   ;;  %v1732_v21 = vld [vmem:[%s2089_s0 + $0xc0] sm:$0xff]   ;;  %v1733_v22 = vld [vmem:[%s2089_s0 + $0x48] sm:$0xff]  }
  0x26   :  { %v1734_v23 = vld [vmem:[%s2089_s0 + $0xc8] sm:$0xff]   ;;  %v1735_v24 = vld [vmem:[%s2089_s0 + $0x50] sm:$0xff]   ;;  %v1737_v26 = vld [vmem:[%s2089_s0 + $0x58] sm:$0xff]  }
  0x27   :  { %v1736_v25 = vld [vmem:[%s2089_s0 + $0xd0] sm:$0xff]   ;;  %v1738_v27 = vld [vmem:[%s2089_s0 + $0xd8] sm:$0xff]   ;;  %v1739_v28 = vld [vmem:[%s2089_s0 + $0x60] sm:$0xff]  }
  0x28   :  { %v1740_v29 = vld [vmem:[%s2089_s0 + $0xe0] sm:$0xff]   ;;  %v1741_v30 = vld [vmem:[%s2089_s0 + $0x68] sm:$0xff]   ;;  %v1743_v32 = vld [vmem:[%s2089_s0 + $0x70] sm:$0xff]  }
  0x29   :  { %v1742_v31 = vld [vmem:[%s2089_s0 + $0xe8] sm:$0xff]   ;;  %v1744_v33 = vld [vmem:[%s2089_s0 + $0xf0] sm:$0xff]   ;;  %v1745_v34 = vld [vmem:[%s2089_s0 + $0x78] sm:$0xff]  }
  0x2a   :  { %1649 = vmatmul.mubr.msk.bf16.gmra.mrb[12].mxu0 %vm275_vm0, %v1729_v18  ;;  %1681 = vmatmul.mubr.msk.bf16.gmra.mrb[12].mxu1 %vm275_vm0, %v1730_v19  ;;  %v1746_v35 = vld [vmem:[%s2089_s0 + $0xf8] sm:$0xff]   ;;  %v1942_v36 = vld [vmem:[%s2091_s2] ss:$0 sm:$0xff]  ;;  %s1771_s0 = smov [#allocation2]  }
  0x2b   :  { %1652 = vmatprep.mubr.msk.bf16.mxu0 %vm275_vm0, %v1731_v20  ;;  %1684 = vmatprep.mubr.msk.bf16.mxu1 %vm275_vm0, %v1732_v21  ;;  %v1947_v38 = vld [vmem:[%s2092_s3] ss:$0 sm:$0xff]  ;;  %s1192_s2 = sshll.u32 %s1771_s0, 4  ;;  %s1193_s2 = int_to_ptr.vmem [resolvable:$true] %s1192_s2 }
  0x2c   :  { %s1747_s3 = scalar_lea.vmem %s1193_s2, 4096  ;;  %p1752_p1 = scmp.lt.s32.totalorder %s1193_s2, %s1193_s2 }
  0x2d   :  { %p1748_p0 = scmp.ne.s32.totalorder %s1193_s2, %s1747_s3  ;;  %p1753_p2 = scmp.lt.s32.totalorder %s1747_s3, %s1747_s3 }
  0x2f   :  { %p1754_p3 = por %p1753_p2, %p1752_p1 }
  0x31   :  { %p1755_p4 = pnand %p1754_p3, %p1748_p0 }
  0x32   :  { %1653 = vmatmul.mubr.msk.bf16.gmra.mrb[16].mxu0 %vm275_vm0, %v1733_v22  ;;  %1685 = vmatmul.mubr.msk.bf16.gmra.mrb[16].mxu1 %vm275_vm0, %v1734_v23 }
  0x33   :  { %1656 = vmatprep.mubr.msk.bf16.mxu0 %vm275_vm0, %v1735_v24  ;;  %1688 = vmatprep.mubr.msk.bf16.mxu1 %vm275_vm0, %v1736_v25 }
  0x3a   :  { %1657 = vmatmul.mubr.msk.bf16.gmra.mrb[20].mxu0 %vm275_vm0, %v1737_v26  ;;  %1689 = vmatmul.mubr.msk.bf16.gmra.mrb[20].mxu1 %vm275_vm0, %v1738_v27 }
  0x3b   :  { %1660 = vmatprep.mubr.msk.bf16.mxu0 %vm275_vm0, %v1739_v28  ;;  %1692 = vmatprep.mubr.msk.bf16.mxu1 %vm275_vm0, %v1740_v29 }
  0x42   :  { %1661 = vmatmul.mubr.msk.bf16.gmra.mrb[24].mxu0 %vm275_vm0, %v1741_v30  ;;  %1693 = vmatmul.mubr.msk.bf16.gmra.mrb[24].mxu1 %vm275_vm0, %v1742_v31 }
  0x43   :  { %1664 = vmatprep.mubr.msk.bf16.mxu0 %vm275_vm0, %v1743_v32  ;;  %1696 = vmatprep.mubr.msk.bf16.mxu1 %vm275_vm0, %v1744_v33 }
  0x4a   :  { %1665 = vmatmul.mubr.msk.bf16.gmra.mrb[28].mxu0 %vm275_vm0, %v1745_v34  ;;  %1697 = vmatmul.mubr.msk.bf16.gmra.mrb[28].mxu1 %vm275_vm0, %v1746_v35 }
  0xe5   :  { %v1638_v37 = vpop.f32.mrb[0].mxu0  ;;  %v1670_v39 = vpop.f32.mrb[0].mxu1 }
  0xe6   :  { %v670_v40 = vmul.f32 %v1638_v37, %v1942_v36  ;;  %v702_v41 = vmul.f32 %v1670_v39, %v1942_v36  ;;  %v406_v42 = vpop.f32.mrb[1].mxu0  ;;  %v534_v43 = vpop.f32.mrb[1].mxu1 }
  0xe7   :  { %v668_v44 = vmul.f32 %v1942_v36, %v406_v42  ;;  %v700_v45 = vmul.f32 %v1942_v36, %v534_v43  ;;  %v1639_v46 = vpop.f32.mrb[2].mxu0  ;;  %v1671_v47 = vpop.f32.mrb[2].mxu1 }
  0xe8   :  { %v741_v48 = vadd.f32 %v1947_v38, %v670_v40  ;;  %v773_v49 = vadd.f32 %v1947_v38, %v702_v41  ;;  %v671_v50 = vmul.f32 %v1639_v46, %v1942_v36  ;;  %v703_v51 = vmul.f32 %v1671_v47, %v1942_v36  ;;  %v409_v52 = vpop.f32.mrb[3].mxu0  ;;  %v537_v53 = vpop.f32.mrb[3].mxu1 }
  0xe9   :  { %v739_v54 = vadd.f32 %v1947_v38, %v668_v44  ;;  %v771_v55 = vadd.f32 %v1947_v38, %v700_v45  ;;  %v669_v56 = vmul.f32 %v1942_v36, %v409_v52  ;;  %v701_v57 = vmul.f32 %v1942_v36, %v537_v53 }
  0xea   :  { %v742_v58 = vadd.f32 %v1947_v38, %v671_v50  ;;  %v774_v59 = vadd.f32 %v1947_v38, %v703_v51  ;;  %v805_v62 = vmax.f32 %v741_v48, 0.0  ;;  %v837_v63 = vmax.f32 %v773_v49, 0.0 }
  0xeb   :  { %v740_v60 = vadd.f32 %v1947_v38, %v669_v56  ;;  %v772_v61 = vadd.f32 %v1947_v38, %v701_v57  ;;  %v803_v2 = vmax.f32 %v739_v54, 0.0  ;;  %v835_v3 = vmax.f32 %v771_v55, 0.0 }
  0xec   :  { %v806_v0 = vmax.f32 %v742_v58, 0.0  ;;  %v838_v1 = vmax.f32 %v774_v59, 0.0 }
  0xed   :  { %v804_v4 = vmax.f32 %v740_v60, 0.0  ;;  %v836_v5 = vmax.f32 %v772_v61, 0.0  ;;  %v1642_v6 = vpop.f32.mrb[4].mxu0  ;;  %v1674_v7 = vpop.f32.mrb[4].mxu1 }
  0xee   :  { %v1409_v8 = vpack.c.bf16 %v806_v0, %v805_v62  ;;  %v1489_v9 = vpack.c.bf16 %v838_v1, %v837_v63  ;;  %v674_v10 = vmul.f32 %v1642_v6, %v1942_v36  ;;  %v706_v11 = vmul.f32 %v1674_v7, %v1942_v36  ;;  %v422_v12 = vpop.f32.mrb[5].mxu0  ;;  %v550_v13 = vpop.f32.mrb[5].mxu1 }
  0xef   :  { %v1404_v14 = vpack.c.bf16 %v804_v4, %v803_v2  ;;  %v1484_v15 = vpack.c.bf16 %v836_v5, %v835_v3  ;;  %v672_v16 = vmul.f32 %v1942_v36, %v422_v12  ;;  %v704_v17 = vmul.f32 %v1942_v36, %v550_v13  ;;  %v1643_v18 = vpop.f32.mrb[6].mxu0  ;;  %v1675_v19 = vpop.f32.mrb[6].mxu1 }
  0xf0   :  { %1561 = vst [vmem:[#allocation2 + $0x8] sm:$0xff] %v1409_v8   ;;  %1577 = vst [vmem:[#allocation2 + $0x88] sm:$0xff] %v1489_v9   ;;  %v745_v20 = vadd.f32 %v1947_v38, %v674_v10  ;;  %v777_v21 = vadd.f32 %v1947_v38, %v706_v11  ;;  %v675_v22 = vmul.f32 %v1643_v18, %v1942_v36  ;;  %v425_v24 = vpop.f32.mrb[7].mxu0  ;;  %v553_v25 = vpop.f32.mrb[7].mxu1 }
  0xf1   :  { %v707_v23 = vmul.f32 %v1675_v19, %v1942_v36  ;;  %1405 = vst [vmem:[#allocation2] sm:$0xff] %v1404_v14   ;;  %1576 = vst [vmem:[#allocation2 + $0x80] sm:$0xff] %v1484_v15   ;;  %v743_v26 = vadd.f32 %v1947_v38, %v672_v16  ;;  %v775_v27 = vadd.f32 %v1947_v38, %v704_v17 }
  0xf2   :  { %v673_v28 = vmul.f32 %v1942_v36, %v425_v24  ;;  %v705_v29 = vmul.f32 %v1942_v36, %v553_v25  ;;  %v746_v30 = vadd.f32 %v1947_v38, %v675_v22  ;;  %v809_v34 = vmax.f32 %v745_v20, 0.0 }
  0xf3   :  { %v778_v31 = vadd.f32 %v1947_v38, %v707_v23  ;;  %v841_v35 = vmax.f32 %v777_v21, 0.0  ;;  %v807_v40 = vmax.f32 %v743_v26, 0.0  ;;  %v839_v41 = vmax.f32 %v775_v27, 0.0 }
  0xf4   :  { %v744_v32 = vadd.f32 %v1947_v38, %v673_v28  ;;  %v776_v33 = vadd.f32 %v1947_v38, %v705_v29  ;;  %v810_v37 = vmax.f32 %v746_v30, 0.0 }
  0xf5   :  { %v842_v39 = vmax.f32 %v778_v31, 0.0  ;;  %v1646_v44 = vpop.f32.mrb[8].mxu0  ;;  %v1678_v45 = vpop.f32.mrb[8].mxu1 }
  0xf6   :  { %v808_v42 = vmax.f32 %v744_v32, 0.0  ;;  %v840_v43 = vmax.f32 %v776_v33, 0.0  ;;  %v1419_v46 = vpack.c.bf16 %v810_v37, %v809_v34  ;;  %v678_v48 = vmul.f32 %v1646_v44, %v1942_v36  ;;  %v438_v50 = vpop.f32.mrb[9].mxu0  ;;  %v566_v51 = vpop.f32.mrb[9].mxu1 }
  0xf7   :  { %v1499_v47 = vpack.c.bf16 %v842_v39, %v841_v35  ;;  %v710_v49 = vmul.f32 %v1678_v45, %v1942_v36  ;;  %v676_v54 = vmul.f32 %v1942_v36, %v438_v50  ;;  %v708_v55 = vmul.f32 %v1942_v36, %v566_v51  ;;  %v1647_v56 = vpop.f32.mrb[10].mxu0  ;;  %v1679_v57 = vpop.f32.mrb[10].mxu1 }
  0xf8   :  { %v1414_v52 = vpack.c.bf16 %v808_v42, %v807_v40  ;;  %v1494_v53 = vpack.c.bf16 %v840_v43, %v839_v41  ;;  %1563 = vst [vmem:[#allocation2 + $0x18] sm:$0xff] %v1419_v46   ;;  %v749_v58 = vadd.f32 %v1947_v38, %v678_v48  ;;  %v679_v60 = vmul.f32 %v1647_v56, %v1942_v36  ;;  %v441_v62 = vpop.f32.mrb[11].mxu0  ;;  %v569_v63 = vpop.f32.mrb[11].mxu1 }
  0xf9   :  { %1579 = vst [vmem:[#allocation2 + $0x98] sm:$0xff] %v1499_v47   ;;  %v781_v59 = vadd.f32 %v1947_v38, %v710_v49  ;;  %v711_v61 = vmul.f32 %v1679_v57, %v1942_v36  ;;  %v747_v0 = vadd.f32 %v1947_v38, %v676_v54  ;;  %v779_v1 = vadd.f32 %v1947_v38, %v708_v55 }
  0xfa   :  { %1562 = vst [vmem:[#allocation2 + $0x10] sm:$0xff] %v1414_v52   ;;  %1578 = vst [vmem:[#allocation2 + $0x90] sm:$0xff] %v1494_v53   ;;  %v677_v2 = vmul.f32 %v1942_v36, %v441_v62  ;;  %v709_v3 = vmul.f32 %v1942_v36, %v569_v63  ;;  %v750_v4 = vadd.f32 %v1947_v38, %v679_v60  ;;  %v813_v8 = vmax.f32 %v749_v58, 0.0 }
  0xfb   :  { %v782_v5 = vadd.f32 %v1947_v38, %v711_v61  ;;  %v845_v9 = vmax.f32 %v781_v59, 0.0  ;;  %v811_v12 = vmax.f32 %v747_v0, 0.0  ;;  %v843_v13 = vmax.f32 %v779_v1, 0.0 }
  0xfc   :  { %v748_v6 = vadd.f32 %v1947_v38, %v677_v2  ;;  %v780_v7 = vadd.f32 %v1947_v38, %v709_v3  ;;  %v814_v10 = vmax.f32 %v750_v4, 0.0 }
  0xfd   :  { %v846_v11 = vmax.f32 %v782_v5, 0.0  ;;  %v1650_v16 = vpop.f32.mrb[12].mxu0  ;;  %v1682_v17 = vpop.f32.mrb[12].mxu1 }
  0xfe   :  { %v812_v14 = vmax.f32 %v748_v6, 0.0  ;;  %v844_v15 = vmax.f32 %v780_v7, 0.0  ;;  %v1429_v18 = vpack.c.bf16 %v814_v10, %v813_v8  ;;  %v682_v20 = vmul.f32 %v1650_v16, %v1942_v36  ;;  %v454_v22 = vpop.f32.mrb[13].mxu0  ;;  %v582_v23 = vpop.f32.mrb[13].mxu1 }
  0xff   :  { %v1509_v19 = vpack.c.bf16 %v846_v11, %v845_v9  ;;  %v714_v21 = vmul.f32 %v1682_v17, %v1942_v36  ;;  %v680_v26 = vmul.f32 %v1942_v36, %v454_v22  ;;  %v712_v27 = vmul.f32 %v1942_v36, %v582_v23  ;;  %v1651_v28 = vpop.f32.mrb[14].mxu0  ;;  %v1683_v29 = vpop.f32.mrb[14].mxu1 }
 0x100   :  { %v1424_v24 = vpack.c.bf16 %v812_v14, %v811_v12  ;;  %v1504_v25 = vpack.c.bf16 %v844_v15, %v843_v13  ;;  %1565 = vst [vmem:[#allocation2 + $0x28] sm:$0xff] %v1429_v18   ;;  %v753_v30 = vadd.f32 %v1947_v38, %v682_v20  ;;  %v683_v32 = vmul.f32 %v1651_v28, %v1942_v36  ;;  %v457_v34 = vpop.f32.mrb[15].mxu0  ;;  %v585_v35 = vpop.f32.mrb[15].mxu1 }
 0x101   :  { %1581 = vst [vmem:[#allocation2 + $0xa8] sm:$0xff] %v1509_v19   ;;  %v785_v31 = vadd.f32 %v1947_v38, %v714_v21  ;;  %v715_v33 = vmul.f32 %v1683_v29, %v1942_v36  ;;  %v751_v37 = vadd.f32 %v1947_v38, %v680_v26  ;;  %v783_v39 = vadd.f32 %v1947_v38, %v712_v27 }
 0x102   :  { %1564 = vst [vmem:[#allocation2 + $0x20] sm:$0xff] %v1424_v24   ;;  %1580 = vst [vmem:[#allocation2 + $0xa0] sm:$0xff] %v1504_v25   ;;  %v681_v40 = vmul.f32 %v1942_v36, %v457_v34  ;;  %v713_v41 = vmul.f32 %v1942_v36, %v585_v35  ;;  %v754_v42 = vadd.f32 %v1947_v38, %v683_v32  ;;  %v817_v46 = vmax.f32 %v753_v30, 0.0 }
 0x103   :  { %v786_v43 = vadd.f32 %v1947_v38, %v715_v33  ;;  %v849_v47 = vmax.f32 %v785_v31, 0.0  ;;  %v815_v50 = vmax.f32 %v751_v37, 0.0  ;;  %v847_v51 = vmax.f32 %v783_v39, 0.0 }
 0x104   :  { %v752_v44 = vadd.f32 %v1947_v38, %v681_v40  ;;  %v784_v45 = vadd.f32 %v1947_v38, %v713_v41  ;;  %v818_v48 = vmax.f32 %v754_v42, 0.0 }
 0x105   :  { %v850_v49 = vmax.f32 %v786_v43, 0.0  ;;  %v1654_v54 = vpop.f32.mrb[16].mxu0  ;;  %v1686_v55 = vpop.f32.mrb[16].mxu1 }
 0x106   :  { %v816_v52 = vmax.f32 %v752_v44, 0.0  ;;  %v848_v53 = vmax.f32 %v784_v45, 0.0  ;;  %v1439_v56 = vpack.c.bf16 %v818_v48, %v817_v46  ;;  %v686_v58 = vmul.f32 %v1654_v54, %v1942_v36  ;;  %v470_v60 = vpop.f32.mrb[17].mxu0  ;;  %v598_v61 = vpop.f32.mrb[17].mxu1 }
 0x107   :  { %v1519_v57 = vpack.c.bf16 %v850_v49, %v849_v47  ;;  %v718_v59 = vmul.f32 %v1686_v55, %v1942_v36  ;;  %v684_v0 = vmul.f32 %v1942_v36, %v470_v60  ;;  %v716_v1 = vmul.f32 %v1942_v36, %v598_v61  ;;  %v1655_v2 = vpop.f32.mrb[18].mxu0  ;;  %v1687_v3 = vpop.f32.mrb[18].mxu1 }
 0x108   :  { %v1434_v62 = vpack.c.bf16 %v816_v52, %v815_v50  ;;  %v1514_v63 = vpack.c.bf16 %v848_v53, %v847_v51  ;;  %1567 = vst [vmem:[#allocation2 + $0x38] sm:$0xff] %v1439_v56   ;;  %v757_v4 = vadd.f32 %v1947_v38, %v686_v58  ;;  %v687_v6 = vmul.f32 %v1655_v2, %v1942_v36  ;;  %v473_v8 = vpop.f32.mrb[19].mxu0  ;;  %v601_v9 = vpop.f32.mrb[19].mxu1 }
 0x109   :  { %1583 = vst [vmem:[#allocation2 + $0xb8] sm:$0xff] %v1519_v57   ;;  %v789_v5 = vadd.f32 %v1947_v38, %v718_v59  ;;  %v719_v7 = vmul.f32 %v1687_v3, %v1942_v36  ;;  %v755_v10 = vadd.f32 %v1947_v38, %v684_v0  ;;  %v787_v11 = vadd.f32 %v1947_v38, %v716_v1 }
 0x10a   :  { %1566 = vst [vmem:[#allocation2 + $0x30] sm:$0xff] %v1434_v62   ;;  %1582 = vst [vmem:[#allocation2 + $0xb0] sm:$0xff] %v1514_v63   ;;  %v685_v12 = vmul.f32 %v1942_v36, %v473_v8  ;;  %v717_v13 = vmul.f32 %v1942_v36, %v601_v9  ;;  %v758_v14 = vadd.f32 %v1947_v38, %v687_v6  ;;  %v821_v18 = vmax.f32 %v757_v4, 0.0 }
 0x10b   :  { %v790_v15 = vadd.f32 %v1947_v38, %v719_v7  ;;  %v853_v19 = vmax.f32 %v789_v5, 0.0  ;;  %v819_v22 = vmax.f32 %v755_v10, 0.0  ;;  %v851_v23 = vmax.f32 %v787_v11, 0.0 }
 0x10c   :  { %v756_v16 = vadd.f32 %v1947_v38, %v685_v12  ;;  %v788_v17 = vadd.f32 %v1947_v38, %v717_v13  ;;  %v822_v20 = vmax.f32 %v758_v14, 0.0 }
 0x10d   :  { %v854_v21 = vmax.f32 %v790_v15, 0.0  ;;  %v1658_v26 = vpop.f32.mrb[20].mxu0  ;;  %v1690_v27 = vpop.f32.mrb[20].mxu1 }
 0x10e   :  { %v820_v24 = vmax.f32 %v756_v16, 0.0  ;;  %v852_v25 = vmax.f32 %v788_v17, 0.0  ;;  %v1449_v28 = vpack.c.bf16 %v822_v20, %v821_v18  ;;  %v690_v30 = vmul.f32 %v1658_v26, %v1942_v36  ;;  %v486_v32 = vpop.f32.mrb[21].mxu0  ;;  %v614_v33 = vpop.f32.mrb[21].mxu1 }
 0x10f   :  { %v1529_v29 = vpack.c.bf16 %v854_v21, %v853_v19  ;;  %v722_v31 = vmul.f32 %v1690_v27, %v1942_v36  ;;  %v688_v37 = vmul.f32 %v1942_v36, %v486_v32  ;;  %v720_v39 = vmul.f32 %v1942_v36, %v614_v33  ;;  %v1659_v40 = vpop.f32.mrb[22].mxu0  ;;  %v1691_v41 = vpop.f32.mrb[22].mxu1 }
 0x110   :  { %v1444_v34 = vpack.c.bf16 %v820_v24, %v819_v22  ;;  %v1524_v35 = vpack.c.bf16 %v852_v25, %v851_v23  ;;  %1569 = vst [vmem:[#allocation2 + $0x48] sm:$0xff] %v1449_v28   ;;  %v761_v42 = vadd.f32 %v1947_v38, %v690_v30  ;;  %v691_v44 = vmul.f32 %v1659_v40, %v1942_v36  ;;  %v489_v46 = vpop.f32.mrb[23].mxu0  ;;  %v617_v47 = vpop.f32.mrb[23].mxu1 }
 0x111   :  { %1585 = vst [vmem:[#allocation2 + $0xc8] sm:$0xff] %v1529_v29   ;;  %v793_v43 = vadd.f32 %v1947_v38, %v722_v31  ;;  %v723_v45 = vmul.f32 %v1691_v41, %v1942_v36  ;;  %v759_v48 = vadd.f32 %v1947_v38, %v688_v37  ;;  %v791_v49 = vadd.f32 %v1947_v38, %v720_v39 }
 0x112   :  { %1568 = vst [vmem:[#allocation2 + $0x40] sm:$0xff] %v1444_v34   ;;  %1584 = vst [vmem:[#allocation2 + $0xc0] sm:$0xff] %v1524_v35   ;;  %v689_v50 = vmul.f32 %v1942_v36, %v489_v46  ;;  %v721_v51 = vmul.f32 %v1942_v36, %v617_v47  ;;  %v762_v52 = vadd.f32 %v1947_v38, %v691_v44  ;;  %v825_v56 = vmax.f32 %v761_v42, 0.0 }
 0x113   :  { %v794_v53 = vadd.f32 %v1947_v38, %v723_v45  ;;  %v857_v57 = vmax.f32 %v793_v43, 0.0  ;;  %v823_v60 = vmax.f32 %v759_v48, 0.0  ;;  %v855_v61 = vmax.f32 %v791_v49, 0.0 }
 0x114   :  { %v760_v54 = vadd.f32 %v1947_v38, %v689_v50  ;;  %v792_v55 = vadd.f32 %v1947_v38, %v721_v51  ;;  %v826_v58 = vmax.f32 %v762_v52, 0.0 }
 0x115   :  { %v858_v59 = vmax.f32 %v794_v53, 0.0  ;;  %v1662_v0 = vpop.f32.mrb[24].mxu0  ;;  %v1694_v1 = vpop.f32.mrb[24].mxu1 }
 0x116   :  { %v824_v62 = vmax.f32 %v760_v54, 0.0  ;;  %v856_v63 = vmax.f32 %v792_v55, 0.0  ;;  %v1459_v2 = vpack.c.bf16 %v826_v58, %v825_v56  ;;  %v694_v4 = vmul.f32 %v1662_v0, %v1942_v36  ;;  %v502_v6 = vpop.f32.mrb[25].mxu0  ;;  %v630_v7 = vpop.f32.mrb[25].mxu1 }
 0x117   :  { %v1539_v3 = vpack.c.bf16 %v858_v59, %v857_v57  ;;  %v726_v5 = vmul.f32 %v1694_v1, %v1942_v36  ;;  %v692_v10 = vmul.f32 %v1942_v36, %v502_v6  ;;  %v724_v11 = vmul.f32 %v1942_v36, %v630_v7  ;;  %v1663_v12 = vpop.f32.mrb[26].mxu0  ;;  %v1695_v13 = vpop.f32.mrb[26].mxu1 }
 0x118   :  { %v1454_v8 = vpack.c.bf16 %v824_v62, %v823_v60  ;;  %v1534_v9 = vpack.c.bf16 %v856_v63, %v855_v61  ;;  %1571 = vst [vmem:[#allocation2 + $0x58] sm:$0xff] %v1459_v2   ;;  %v765_v14 = vadd.f32 %v1947_v38, %v694_v4  ;;  %v695_v16 = vmul.f32 %v1663_v12, %v1942_v36  ;;  %v505_v18 = vpop.f32.mrb[27].mxu0  ;;  %v633_v19 = vpop.f32.mrb[27].mxu1 }
 0x119   :  { %1587 = vst [vmem:[#allocation2 + $0xd8] sm:$0xff] %v1539_v3   ;;  %v797_v15 = vadd.f32 %v1947_v38, %v726_v5  ;;  %v727_v17 = vmul.f32 %v1695_v13, %v1942_v36  ;;  %v763_v20 = vadd.f32 %v1947_v38, %v692_v10  ;;  %v795_v21 = vadd.f32 %v1947_v38, %v724_v11 }
 0x11a   :  { %1570 = vst [vmem:[#allocation2 + $0x50] sm:$0xff] %v1454_v8   ;;  %1586 = vst [vmem:[#allocation2 + $0xd0] sm:$0xff] %v1534_v9   ;;  %v693_v22 = vmul.f32 %v1942_v36, %v505_v18  ;;  %v725_v23 = vmul.f32 %v1942_v36, %v633_v19  ;;  %v766_v24 = vadd.f32 %v1947_v38, %v695_v16  ;;  %v829_v28 = vmax.f32 %v765_v14, 0.0 }
 0x11b   :  { %v798_v25 = vadd.f32 %v1947_v38, %v727_v17  ;;  %v861_v29 = vmax.f32 %v797_v15, 0.0  ;;  %v827_v32 = vmax.f32 %v763_v20, 0.0  ;;  %v859_v33 = vmax.f32 %v795_v21, 0.0 }
 0x11c   :  { %v764_v26 = vadd.f32 %v1947_v38, %v693_v22  ;;  %v796_v27 = vadd.f32 %v1947_v38, %v725_v23  ;;  %v830_v30 = vmax.f32 %v766_v24, 0.0 }
 0x11d   :  { %v862_v31 = vmax.f32 %v798_v25, 0.0  ;;  %v1666_v37 = vpop.f32.mrb[28].mxu0  ;;  %v1698_v39 = vpop.f32.mrb[28].mxu1 }
 0x11e   :  { %v828_v34 = vmax.f32 %v764_v26, 0.0  ;;  %v860_v35 = vmax.f32 %v796_v27, 0.0  ;;  %v1469_v40 = vpack.c.bf16 %v830_v30, %v829_v28  ;;  %v698_v42 = vmul.f32 %v1666_v37, %v1942_v36  ;;  %v518_v44 = vpop.f32.mrb[29].mxu0  ;;  %v646_v45 = vpop.f32.mrb[29].mxu1 }
 0x11f   :  { %v1549_v41 = vpack.c.bf16 %v862_v31, %v861_v29  ;;  %v730_v43 = vmul.f32 %v1698_v39, %v1942_v36  ;;  %v696_v48 = vmul.f32 %v1942_v36, %v518_v44  ;;  %v728_v49 = vmul.f32 %v1942_v36, %v646_v45  ;;  %v1667_v50 = vpop.f32.mrb[30].mxu0  ;;  %v1699_v51 = vpop.f32.mrb[30].mxu1 }
 0x120   :  { %v1464_v46 = vpack.c.bf16 %v828_v34, %v827_v32  ;;  %v1544_v47 = vpack.c.bf16 %v860_v35, %v859_v33  ;;  %1573 = vst [vmem:[#allocation2 + $0x68] sm:$0xff] %v1469_v40   ;;  %v769_v52 = vadd.f32 %v1947_v38, %v698_v42  ;;  %v699_v54 = vmul.f32 %v1667_v50, %v1942_v36  ;;  %v521_v56 = vpop.f32.mrb[31].mxu0  ;;  %v649_v57 = vpop.f32.mrb[31].mxu1 }
 0x121   :  { %1589 = vst [vmem:[#allocation2 + $0xe8] sm:$0xff] %v1549_v41   ;;  %v801_v53 = vadd.f32 %v1947_v38, %v730_v43  ;;  %v731_v55 = vmul.f32 %v1699_v51, %v1942_v36  ;;  %v767_v58 = vadd.f32 %v1947_v38, %v696_v48  ;;  %v799_v59 = vadd.f32 %v1947_v38, %v728_v49 }
 0x122   :  { %1572 = vst [vmem:[#allocation2 + $0x60] sm:$0xff] %v1464_v46   ;;  %1588 = vst [vmem:[#allocation2 + $0xe0] sm:$0xff] %v1544_v47   ;;  %v697_v60 = vmul.f32 %v1942_v36, %v521_v56  ;;  %v729_v61 = vmul.f32 %v1942_v36, %v649_v57  ;;  %v770_v62 = vadd.f32 %v1947_v38, %v699_v54  ;;  %v833_v2 = vmax.f32 %v769_v52, 0.0 }
 0x123   :  { %v802_v63 = vadd.f32 %v1947_v38, %v731_v55  ;;  %v865_v3 = vmax.f32 %v801_v53, 0.0  ;;  %v831_v6 = vmax.f32 %v767_v58, 0.0  ;;  %v863_v7 = vmax.f32 %v799_v59, 0.0 }
 0x124   :  { %v768_v0 = vadd.f32 %v1947_v38, %v697_v60  ;;  %v800_v1 = vadd.f32 %v1947_v38, %v729_v61  ;;  %v834_v4 = vmax.f32 %v770_v62, 0.0 }
 0x125   :  { %v866_v5 = vmax.f32 %v802_v63, 0.0 }
 0x126   :  { %v832_v8 = vmax.f32 %v768_v0, 0.0  ;;  %v864_v9 = vmax.f32 %v800_v1, 0.0  ;;  %v1479_v10 = vpack.c.bf16 %v834_v4, %v833_v2 }
 0x127   :  { %v1559_v36 = vpack.c.bf16 %v866_v5, %v865_v3 }
 0x128   :  { %v1474_v11 = vpack.c.bf16 %v832_v8, %v831_v6  ;;  %v1554_v12 = vpack.c.bf16 %v864_v9, %v863_v7  ;;  %1575 = vst [vmem:[#allocation2 + $0x78] sm:$0xff] %v1479_v10  }
 0x129   :  { %1591 = vst [vmem:[#allocation2 + $0xf8] sm:$0xff] %v1559_v36  }
 0x12a   :  { %1574 = vst [vmem:[#allocation2 + $0x70] sm:$0xff] %v1474_v11   ;;  %1590 = vst [vmem:[#allocation2 + $0xf0] sm:$0xff] %v1554_v12  }
 0x12b   :  { %1758 = shalt.err (!%p1755_p4)
}
 0x12c   :  { %s1759_s12 = scalar_lea.hbm %s2093_s4, 4096 }
 0x12d   :  { %p1760_p5 = scmp.ne.s32.totalorder %s2093_s4, %s1759_s12  ;;  %p1763_p6 = scmp.lt.u32.totalorder %s1759_s12, %s2093_s4 }
 0x12f   :  { %p1765_p7 = pnand %p1763_p6, %p1760_p5 }
 0x131   :  { %1768 = shalt.err (!%p1765_p7)
}
 0x132   :  { %s1772_s17 = smov 64   ;;  %s1773_s18 = smov 4  }
 0x133   :  { %1198 = dma.vmem_to_hbm [thread:$0]  %s1193_s2, 4096, %s2093_s4, [#allocation3], %s1772_s17, %s1772_s17, %s1773_s18  }
 0x134   :  { %1769 = dma.done.wait [#allocation3], 4096  }
 0x135   :  { %1770 = vsyncadd [#allocation3], 4294963200 }
 0x136   :  { %1202 = vsyncpa [#allocation3], 1 }

</bundles_post_ra>
